<compile_context>
chip_gen: v7x
topology: tpu7x:2x2x1
jax: 0.10.0
libtpu: 0.0.40
codegen_flags: <defaults>
</compile_context>

<pallas_src>
import jax
import jax.numpy as jnp
from jax import lax
from jax.experimental import pallas as pl
from jax.experimental.pallas import tpu as pltpu

_IN, _H1, _H2, _OUT = 28, 60, 30, 4


def _sigmoid(x):
    # sigmoid(x) = 0.5*(tanh(x/2)+1): a single EUP transcendental; the
    # 0.5-mul / add are VALU filler that co-issues.
    return 0.5 * (jnp.tanh(0.5 * x) + 1.0)


def tdgammon_kernel(x_ref, w1_ref, b1_ref, w15_ref, b15_ref, w2_ref, b2_ref,
                    ot_ref):
    # Feature-major (batch-on-lanes) formulation.
    x = x_ref[...].astype(jnp.float32)                       # (TB, 28)

    # fc1: h^T = W1 @ x^T -> (60, TB).  dot_general contracts x's feature
    # axis (axis 1) directly, so x stays batch-major in HBM/VMEM.
    h = lax.dot_general(w1_ref[...], x, (((1,), (1,)), ((), ())),
                        preferred_element_type=jnp.float32)
    h = _sigmoid(h + b1_ref[...])                            # (60, TB)

    # fc15: (30,60) @ (60,TB) -> (30, TB)
    h2 = jnp.dot(w15_ref[...], h, preferred_element_type=jnp.float32)
    h2 = _sigmoid(h2 + b15_ref[...])                         # (30, TB)

    # fc2: (4,30) @ (30,TB) -> (4, TB); store is lane-dense already.
    y = jnp.dot(w2_ref[...], h2, preferred_element_type=jnp.float32)
    ot_ref[...] = _sigmoid(y + b2_ref[...]).astype(ot_ref.dtype)


def tdgammon_forward(x, params, *, tile_b=4096):
    """x: (B, 28) float32 (or bfloat16). params: dict from init_params.

    Returns (B, 4) float32, matching TDGammonNetV2.forward.
    """
    assert tile_b % 128 == 0, "tile_b must be a multiple of 128 (lane width)"
    B = x.shape[0]
    w1, b1, w15, b15, w2, b2 = (params["w1"], params["b1"], params["w15"],
                                params["b15"], params["w2"], params["b2"])

    # Tile selection.  No padding copy of x: Pallas clamps the ragged last
    # block (garbage rows only affect masked-off output columns).
    if B <= 256:
        tb = B                      # single full-extent tile (any B allowed)
    else:
        # Lane-aligned tile, capped so there are >= 2 tiles (v7x: both TCs).
        tb = min(tile_b, ((B // 2 + 127) // 128) * 128)
    num_tiles = pl.cdiv(B, tb)

    def full_spec(arr):
        # Constant-index full-extent block: DMA'd once, stays VMEM-resident.
        return pl.BlockSpec(arr.shape, lambda i: (0,) * arr.ndim)

    flops = 2 * B * (_IN * _H1 + _H1 * _H2 + _H2 * _OUT)
    transcendentals = B * (_H1 + _H2 + _OUT)
    bytes_accessed = (B * (_IN * x.dtype.itemsize + _OUT * 4) +
                      4 * (_IN * _H1 + _H1 + _H1 * _H2 + _H2 +
                           _H2 * _OUT + _OUT))

    out_t = pl.pallas_call(
        tdgammon_kernel,
        out_shape=jax.ShapeDtypeStruct((_OUT, B), jnp.float32),
        grid=(num_tiles,),
        in_specs=[
            pl.BlockSpec((tb, _IN), lambda i: (i, 0)),   # streamed batch tile
            full_spec(w1), full_spec(b1),
            full_spec(w15), full_spec(b15),
            full_spec(w2), full_spec(b2),
        ],
        out_specs=pl.BlockSpec((_OUT, tb), lambda i: (0, i)),
        compiler_params=pltpu.CompilerParams(
            dimension_semantics=("parallel",)),
        cost_estimate=pl.CostEstimate(
            flops=flops,
            transcendentals=transcendentals,
            bytes_accessed=bytes_accessed),
    )(x, w1, b1, w15, b15, w2, b2)

    # Back to the PyTorch layout (B, 4); 4xB transpose is trivial.
    return out_t.T


def init_params(key):
    """Deterministic uniform(-0.05, 0.05) init, matching the PyTorch __init__.

    Weights stored feature-major as (out_features, in_features) — the same
    layout nn.Linear uses — and biases as (out_features, 1), so the kernel's
    feature-major matmuls need no relayout.
    """
    ks = jax.random.split(key, 6)
    u = lambda k, shape: jax.random.uniform(
        k, shape, dtype=jnp.float32, minval=-0.05, maxval=0.05)
    return {
        "w1": u(ks[0], (_H1, _IN)),     # (60, 28)
        "b1": u(ks[1], (_H1, 1)),       # (60, 1)
        "w15": u(ks[2], (_H2, _H1)),    # (30, 60)
        "b15": u(ks[3], (_H2, 1)),      # (30, 1)
        "w2": u(ks[4], (_OUT, _H2)),    # (4, 30)
        "b2": u(ks[5], (_OUT, 1)),      # (4, 1)
    }


def reference_forward(x, params):
    """Pure-JAX reference of the PyTorch forward, for sanity checking."""
    h = jax.nn.sigmoid(x @ params["w1"].T + params["b1"].T)
    h2 = jax.nn.sigmoid(h @ params["w15"].T + params["b15"].T)
    return jax.nn.sigmoid(h2 @ params["w2"].T + params["b2"].T)


if __name__ == "__main__":
    key = jax.random.PRNGKey(0)
    pkey, xkey1, xkey2 = jax.random.split(key, 3)
    params = init_params(pkey)

    # Small batch (single full-extent tile path).
    batch = 8
    x = jax.random.normal(xkey1, (batch, _IN), dtype=jnp.float32)
    y = jax.block_until_ready(tdgammon_forward(x, params))
    y_ref = reference_forward(x, params)
    assert y.shape == (batch, _OUT)
    assert jnp.allclose(y, y_ref, atol=1e-4, rtol=1e-4), "mismatch (batch=8)"

    # Multi-tile path with a ragged last tile (no wrapper padding).
    batch2 = 300
    x2 = jax.random.normal(xkey2, (batch2, _IN), dtype=jnp.float32)
    y2 = jax.block_until_ready(tdgammon_forward(x2, params))
    y2_ref = reference_forward(x2, params)
    assert y2.shape == (batch2, _OUT)
    assert jnp.allclose(y2, y2_ref, atol=1e-4, rtol=1e-4), "mismatch (batch=300)"

    # Optional bf16 input streaming (halves x HBM traffic on v6e/v7x);
    # weights and post-load compute stay f32.
    y3 = jax.block_until_ready(
        tdgammon_forward(x2.astype(jnp.bfloat16), params))
    assert jnp.allclose(y3, y2_ref, atol=1e-2, rtol=1e-2), "mismatch (bf16 x)"

    print("KERNEL_OK")
</pallas_src>

<mosaic_0001>
module attributes {stable_mosaic.version = 11 : i64} {
  func.func @tdgammon_kernel(%arg0: i32, %arg1: memref<8x28xf32, #tpu.memory_space<vmem>>, %arg2: memref<60x28xf32, #tpu.memory_space<vmem>>, %arg3: memref<60x1xf32, #tpu.memory_space<vmem>>, %arg4: memref<30x60xf32, #tpu.memory_space<vmem>>, %arg5: memref<30x1xf32, #tpu.memory_space<vmem>>, %arg6: memref<4x30xf32, #tpu.memory_space<vmem>>, %arg7: memref<4x1xf32, #tpu.memory_space<vmem>>, %arg8: memref<4x8xf32, #tpu.memory_space<vmem>>) attributes {dimension_semantics = [#tpu.dimension_semantics<parallel>], iteration_bounds = array<i64: 1>, scalar_prefetch = 0 : i64, scratch_operands = 0 : i64, tpu.core_type = #tpu.core_type<tc>, window_params = [{transform_indices = @transform_0, window_bounds = array<i64: 8, 28>}, {pipeline_mode = #tpu.pipeline_mode<synchronous>, transform_indices = @transform_1, window_bounds = array<i64: 60, 28>}, {pipeline_mode = #tpu.pipeline_mode<synchronous>, transform_indices = @transform_2, window_bounds = array<i64: 60, 1>}, {pipeline_mode = #tpu.pipeline_mode<synchronous>, transform_indices = @transform_3, window_bounds = array<i64: 30, 60>}, {pipeline_mode = #tpu.pipeline_mode<synchronous>, transform_indices = @transform_4, window_bounds = array<i64: 30, 1>}, {pipeline_mode = #tpu.pipeline_mode<synchronous>, transform_indices = @transform_5, window_bounds = array<i64: 4, 30>}, {pipeline_mode = #tpu.pipeline_mode<synchronous>, transform_indices = @transform_6, window_bounds = array<i64: 4, 1>}, {transform_indices = @transform_7, window_bounds = array<i64: 4, 8>}]} {
    %c0 = arith.constant 0 : index
    %c0_0 = arith.constant 0 : index
    %0 = vector.load %arg1[%c0, %c0_0] : memref<8x28xf32, #tpu.memory_space<vmem>>, vector<8x28xf32>
    %c0_1 = arith.constant 0 : index
    %c0_2 = arith.constant 0 : index
    %1 = vector.load %arg2[%c0_1, %c0_2] : memref<60x28xf32, #tpu.memory_space<vmem>>, vector<60x28xf32>
    %cst = arith.constant dense<0.000000e+00> : vector<60x8xf32>
    %2 = tpu.matmul %1, %0, %cst {dimension_numbers = #tpu.dot_dimension_numbers<[1], [1], [0], [0], [0, 0, 1, 0], [], []>} : vector<60x28xf32>, vector<8x28xf32>, vector<60x8xf32> -> vector<60x8xf32>
    %c0_3 = arith.constant 0 : index
    %c0_4 = arith.constant 0 : index
    %3 = vector.load %arg3[%c0_3, %c0_4] : memref<60x1xf32, #tpu.memory_space<vmem>>, vector<60x1xf32>
    %4 = vector.broadcast %3 : vector<60x1xf32> to vector<60x8xf32>
    %5 = arith.addf %2, %4 : vector<60x8xf32>
    %cst_5 = arith.constant 5.000000e-01 : f32
    %6 = vector.broadcast %cst_5 : f32 to vector<60x8xf32>
    %7 = arith.mulf %6, %5 : vector<60x8xf32>
    %8 = math.tanh %7 : vector<60x8xf32>
    %cst_6 = arith.constant 1.000000e+00 : f32
    %9 = vector.broadcast %cst_6 : f32 to vector<60x8xf32>
    %10 = arith.addf %8, %9 : vector<60x8xf32>
    %cst_7 = arith.constant 5.000000e-01 : f32
    %11 = vector.broadcast %cst_7 : f32 to vector<60x8xf32>
    %12 = arith.mulf %11, %10 : vector<60x8xf32>
    %c0_8 = arith.constant 0 : index
    %c0_9 = arith.constant 0 : index
    %13 = vector.load %arg4[%c0_8, %c0_9] : memref<30x60xf32, #tpu.memory_space<vmem>>, vector<30x60xf32>
    %cst_10 = arith.constant dense<0.000000e+00> : vector<30x8xf32>
    %14 = tpu.matmul %13, %12, %cst_10 {dimension_numbers = #tpu.dot_dimension_numbers<[1], [0], [0], [1], [0, 0, 1, 1], [], []>} : vector<30x60xf32>, vector<60x8xf32>, vector<30x8xf32> -> vector<30x8xf32>
    %c0_11 = arith.constant 0 : index
    %c0_12 = arith.constant 0 : index
    %15 = vector.load %arg5[%c0_11, %c0_12] : memref<30x1xf32, #tpu.memory_space<vmem>>, vector<30x1xf32>
    %16 = vector.broadcast %15 : vector<30x1xf32> to vector<30x8xf32>
    %17 = arith.addf %14, %16 : vector<30x8xf32>
    %cst_13 = arith.constant 5.000000e-01 : f32
    %18 = vector.broadcast %cst_13 : f32 to vector<30x8xf32>
    %19 = arith.mulf %18, %17 : vector<30x8xf32>
    %20 = math.tanh %19 : vector<30x8xf32>
    %cst_14 = arith.constant 1.000000e+00 : f32
    %21 = vector.broadcast %cst_14 : f32 to vector<30x8xf32>
    %22 = arith.addf %20, %21 : vector<30x8xf32>
    %cst_15 = arith.constant 5.000000e-01 : f32
    %23 = vector.broadcast %cst_15 : f32 to vector<30x8xf32>
    %24 = arith.mulf %23, %22 : vector<30x8xf32>
    %c0_16 = arith.constant 0 : index
    %c0_17 = arith.constant 0 : index
    %25 = vector.load %arg6[%c0_16, %c0_17] : memref<4x30xf32, #tpu.memory_space<vmem>>, vector<4x30xf32>
    %cst_18 = arith.constant dense<0.000000e+00> : vector<4x8xf32>
    %26 = tpu.matmul %25, %24, %cst_18 {dimension_numbers = #tpu.dot_dimension_numbers<[1], [0], [0], [1], [0, 0, 1, 1], [], []>} : vector<4x30xf32>, vector<30x8xf32>, vector<4x8xf32> -> vector<4x8xf32>
    %c0_19 = arith.constant 0 : index
    %c0_20 = arith.constant 0 : index
    %27 = vector.load %arg7[%c0_19, %c0_20] : memref<4x1xf32, #tpu.memory_space<vmem>>, vector<4x1xf32>
    %28 = vector.broadcast %27 : vector<4x1xf32> to vector<4x8xf32>
    %29 = arith.addf %26, %28 : vector<4x8xf32>
    %cst_21 = arith.constant 5.000000e-01 : f32
    %30 = vector.broadcast %cst_21 : f32 to vector<4x8xf32>
    %31 = arith.mulf %30, %29 : vector<4x8xf32>
    %32 = math.tanh %31 : vector<4x8xf32>
    %cst_22 = arith.constant 1.000000e+00 : f32
    %33 = vector.broadcast %cst_22 : f32 to vector<4x8xf32>
    %34 = arith.addf %32, %33 : vector<4x8xf32>
    %cst_23 = arith.constant 5.000000e-01 : f32
    %35 = vector.broadcast %cst_23 : f32 to vector<4x8xf32>
    %36 = arith.mulf %35, %34 : vector<4x8xf32>
    %c0_24 = arith.constant 0 : index
    %c0_25 = arith.constant 0 : index
    %37 = vector.load %arg8[%c0_24, %c0_25] : memref<4x8xf32, #tpu.memory_space<vmem>>, vector<4x8xf32>
    tpu.vector_store %arg8[%c0_24, %c0_25], %36 {strides = array<i32>} : memref<4x8xf32, #tpu.memory_space<vmem>>, vector<4x8xf32>,
    return
  }
  func.func @transform_0(%arg0: i32) -> (i32, i32) {
    %c0_i32 = arith.constant 0 : i32
    %c0_i32_0 = arith.constant 0 : i32
    return %arg0, %c0_i32 : i32, i32
  }
  func.func @transform_1(%arg0: i32) -> (i32, i32) {
    %c0_i32 = arith.constant 0 : i32
    %c0_i32_0 = arith.constant 0 : i32
    %c0_i32_1 = arith.constant 0 : i32
    return %c0_i32, %c0_i32_0 : i32, i32
  }
  func.func @transform_2(%arg0: i32) -> (i32, i32) {
    %c0_i32 = arith.constant 0 : i32
    %c0_i32_0 = arith.constant 0 : i32
    %c0_i32_1 = arith.constant 0 : i32
    return %c0_i32, %c0_i32_0 : i32, i32
  }
  func.func @transform_3(%arg0: i32) -> (i32, i32) {
    %c0_i32 = arith.constant 0 : i32
    %c0_i32_0 = arith.constant 0 : i32
    %c0_i32_1 = arith.constant 0 : i32
    return %c0_i32, %c0_i32_0 : i32, i32
  }
  func.func @transform_4(%arg0: i32) -> (i32, i32) {
    %c0_i32 = arith.constant 0 : i32
    %c0_i32_0 = arith.constant 0 : i32
    %c0_i32_1 = arith.constant 0 : i32
    return %c0_i32, %c0_i32_0 : i32, i32
  }
  func.func @transform_5(%arg0: i32) -> (i32, i32) {
    %c0_i32 = arith.constant 0 : i32
    %c0_i32_0 = arith.constant 0 : i32
    %c0_i32_1 = arith.constant 0 : i32
    return %c0_i32, %c0_i32_0 : i32, i32
  }
  func.func @transform_6(%arg0: i32) -> (i32, i32) {
    %c0_i32 = arith.constant 0 : i32
    %c0_i32_0 = arith.constant 0 : i32
    %c0_i32_1 = arith.constant 0 : i32
    return %c0_i32, %c0_i32_0 : i32, i32
  }
  func.func @transform_7(%arg0: i32) -> (i32, i32) {
    %c0_i32 = arith.constant 0 : i32
    %c0_i32_0 = arith.constant 0 : i32
    return %c0_i32, %arg0 : i32, i32
  }
}

</mosaic_0001>

<bundles_post_ra>
// kernel: tpu_custom_call.1
= control target key start
LH: loop header
LB: loop body
LE: loop exit
PB: predicated region body
PF: predicated region fallthrough
CT: control target
= control target key end

     0   :  { %vm84_vm0 = vcmask 228352   ;;  %v672_v3 = vmov 0   ;;  %s827_s0 = inlined_call_operand.vmem [shape: f32[8,28], index: 0, kind: input, shape index: {}]   ;;  %s828_s1 = inlined_call_operand.vmem [shape: f32[60,28], index: 1, kind: input, shape index: {}]   ;;  %s829_s2 = inlined_call_operand.vmem [shape: f32[60,1], index: 2, kind: input, shape index: {}]   ;;  %s830_s3 = inlined_call_operand.vmem [shape: f32[30,60], index: 3, kind: input, shape index: {}]   ;;  %s831_s4 = inlined_call_operand.vmem [shape: f32[30,1], index: 4, kind: input, shape index: {}]   ;;  %s832_s5 = inlined_call_operand.vmem [shape: f32[4,30], index: 5, kind: input, shape index: {}]   ;;  %s833_s6 = inlined_call_operand.vmem [shape: f32[4,1], index: 6, kind: input, shape index: {}]   ;;  %s834_s7 = inlined_call_operand.hbm [shape: f32[4,8], index: 7, kind: output, shape index: {}]  }
   0x1   :  { %v27_v0 = vld [vmem:[%s827_s0] sm:$0xff]  ;;  %v29_v2 = vld [vmem:[%s828_s1 + $0x8] sm:$0xff]  ;;  %620 = vset.pattern.permute.xlu0 %v672_v3  ;;  %v30_v4 = vld [vmem:[%s828_s1 + $0x10] sm:$0xff]  ;;  %621 = vset.pattern.permute.xlu1 %v672_v3 }
   0x2   :  { %v28_v1 = vld [vmem:[%s828_s1] sm:$0xff]  ;;  %542 = vmatprep.subr.msk.mxu0 %vm84_vm0, %v27_v0  ;;  %v38_v6 = vld [vmem:[%s829_s2 + $0x10] sm:$0xff]  ;;  %v37_v7 = vld [vmem:[%s829_s2 + $0x8] sm:$0xff] }
   0x3   :  { %544 = vmatprep.mubr.msk.f32.mxu0 %vm84_vm0, %v28_v1  ;;  %543 = vmatpush3.xpose.msk.msra.mxu0 %vm84_vm0, %v27_v0  ;;  %v36_v5 = vld [vmem:[%s829_s2] sm:$0xff]  ;;  %v39_v8 = vld [vmem:[%s829_s2 + $0x18] sm:$0xff] }
   0x4   :  { %46 = vperm.xlu0 %620, %v36_v5   ;;  %56 = vperm.xlu1 %621, %v38_v6   ;;  %v31_v9 = vld [vmem:[%s828_s1 + $0x18] sm:$0xff]  ;;  %v32_v10 = vld [vmem:[%s828_s1 + $0x20] sm:$0xff] }
   0x6   :  { %545 = vmatmul.mubr.msk.f32.vlgmr.msra.gmra.mrb[0].mxu0 %vm84_vm0, %v29_v2 }
   0x7   :  { %547 = vmatprep.mubr.msk.f32.mxu0 %vm84_vm0, %v30_v4 }
   0x8   :  { %12 = vsyncpa [#allocation3], 0  ;;  %51 = vperm.xlu0 %620, %v37_v7   ;;  %61 = vperm.xlu1 %621, %v39_v8   ;;  %v40_v11 = vld [vmem:[%s829_s2 + $0x20] sm:$0xff]  ;;  %v41_v12 = vld [vmem:[%s829_s2 + $0x28] sm:$0xff]  ;;  %vm277_vm1 = vcmask 490496   ;;  %vm290_vm2 = vcmask 1043456  }
   0x9   :  { %v33_v13 = vld [vmem:[%s828_s1 + $0x28] sm:$0xff]  ;;  %v34_v14 = vld [vmem:[%s828_s1 + $0x30] sm:$0xff]  ;;  %v43_v16 = vld [vmem:[%s829_s2 + $0x38] sm:$0xf]  ;;  %vm673_vm3 = vmmov 1   ;;  %vm675_vm5 = vmmov 0  }
   0xa   :  { %548 = vmatmul.mubr.msk.f32.gmra.mrb[2].mxu0 %vm84_vm0, %v31_v9  ;;  %v42_v15 = vld [vmem:[%s829_s2 + $0x30] sm:$0xff]  ;;  %v35_v17 = vld [vmem:[%s828_s1 + $0x38] sm:$0xf]  ;;  %v253_v18 = vld [vmem:[%s831_s4] sm:$0xff]  ;;  %vm406_vm6 = vcmask 1045504   ;;  %vm402_vm8 = vcmask 244736  }
   0xb   :  { %550 = vmatprep.mubr.msk.f32.mxu0 %vm84_vm0, %v32_v10  ;;  %v254_v19 = vld [vmem:[%s831_s4 + $0x8] sm:$0xff]  ;;  %v255_v20 = vld [vmem:[%s831_s4 + $0x10] sm:$0xff]  ;;  %v256_v21 = vld [vmem:[%s831_s4 + $0x18] sm:$0x3f]  ;;  %s677_s25 = smov [#allocation2]   ;;  %vm484_vm9 = vcmask 60416  }
   0xc   :  { %66 = vperm.xlu0 %620, %v40_v11   ;;  %71 = vperm.xlu1 %621, %v41_v12   ;;  %v396_v22 = vld [vmem:[%s833_s6] sm:$0xf]  ;;  %vm602_vm4 = vmpackc.low %vm290_vm2, %vm673_vm3  ;;  %s492_s26 = sshll.u32 %s677_s25, 4  ;;  %s493_s26 = int_to_ptr.vmem [resolvable:$true] %s492_s26 }
   0xd   :  { %v249_v23 = vld [vmem:[%s830_s3] sm:$0xff]  ;;  %vm612_vm7 = vmpackc.low %vm406_vm6, %vm673_vm3  ;;  %s648_s27 = scalar_lea.vmem %s493_s26, 64  ;;  %p653_p1 = scmp.lt.s32.totalorder %s493_s26, %s493_s26 }
   0xe   :  { %551 = vmatmul.mubr.msk.f32.gmra.mrb[4].mxu0 %vm84_vm0, %v33_v13  ;;  %572 = vmatprep.mubr.msk.f32.mxu1 %vm277_vm1, %v249_v23  ;;  %v674_v23 = vmov 0.0|0.0   ;;  %p649_p0 = scmp.ne.s32.totalorder %s493_s26, %s648_s27  ;;  %p654_p2 = scmp.lt.s32.totalorder %s648_s27, %s648_s27 }
   0xf   :  { %553 = vmatprep.mubr.msk.f32.mxu0 %vm84_vm0, %v34_v14  ;;  %607 = vmatprep.subr.bf16.mxu0 %v674_v23 }
  0x10   :  { %76 = vperm.xlu0 %620, %v42_v15   ;;  %81 = vperm.xlu1 %621, %v43_v16   ;;  %p655_p3 = por %p654_p2, %p653_p1 }
  0x12   :  { %554 = vmatmul.mubr.msk.f32.gmra.mrb[6].mxu0 %vm84_vm0, %v35_v17  ;;  %p656_p4 = pnand %p655_p3, %p649_p0 }
  0x14   :  { %259 = vperm.xlu0 %620, %v253_v18   ;;  %264 = vperm.xlu1 %621, %v254_v19  }
  0x18   :  { %269 = vperm.xlu0 %620, %v255_v20   ;;  %274 = vperm.xlu1 %621, %v256_v21   ;;  %v250_v20 = vld [vmem:[%s830_s3 + $0x8] sm:$0xff]  ;;  %v251_v21 = vld [vmem:[%s830_s3 + $0x10] sm:$0xff] }
  0x1c   :  { %399 = vperm.xlu0 %620, %v396_v22   ;;  %v252_v22 = vld [vmem:[%s830_s3 + $0x18] sm:$0x3f] }
  0x83   :  { %v47_v24 = vpop.permute.xlu0 %46  ;;  %v57_v25 = vpop.permute.xlu1 %56 }
  0x87   :  { %v52_v26 = vpop.permute.xlu0 %51  ;;  %v62_v27 = vpop.permute.xlu1 %61 }
  0x8b   :  { %v72_v37 = vpop.permute.xlu1 %71  ;;  %v67_v39 = vpop.permute.xlu0 %66 }
  0x8f   :  { %v82_v47 = vpop.permute.xlu1 %81  ;;  %v77_v50 = vpop.permute.xlu0 %76 }
  0xd9   :  { %v546_v28 = vpop.f32.mrb[0].mxu0 }
  0xda   :  { %v184_v29 = vadd.f32 %v546_v28, %v52_v26  ;;  %v178_v30 = vpop.f32.mrb[1].mxu0  ;;  %v260_v26 = vpop.permute.xlu0 %259 }
  0xdb   :  { %v179_v31 = vadd.f32 %v178_v30, %v47_v24  ;;  %v676_v24 = vmov 0.0  }
  0xdc   :  { %v218_v32 = vmul.f32 0.5, %v184_v29  ;;  %586 = vmatprep.mubr.msk.f32.mxu0 %vm675_vm5, %v676_v24 }
  0xdd   :  { %v217_v33 = vmul.f32 0.5, %v179_v31  ;;  %v549_v34 = vpop.f32.mrb[2].mxu0 }
  0xde   :  { %622 = vtanh.f32 %v218_v32  ;;  %v194_v35 = vadd.f32 %v549_v34, %v62_v27  ;;  %v188_v36 = vpop.f32.mrb[3].mxu0 }
  0xdf   :  { %624 = vtanh.f32 %v217_v33  ;;  %v189_v38 = vadd.f32 %v188_v36, %v57_v25  ;;  %v265_v25 = vpop.permute.xlu1 %264 }
  0xe0   :  { %v220_v40 = vmul.f32 0.5, %v194_v35  ;;  %v270_v35 = vpop.permute.xlu0 %269 }
  0xe1   :  { %v219_v41 = vmul.f32 0.5, %v189_v38  ;;  %v552_v42 = vpop.f32.mrb[4].mxu0 }
  0xe2   :  { %626 = vtanh.f32 %v220_v40  ;;  %v204_v43 = vadd.f32 %v552_v42, %v72_v37  ;;  %v198_v44 = vpop.f32.mrb[5].mxu0 }
  0xe3   :  { %628 = vtanh.f32 %v219_v41  ;;  %v199_v45 = vadd.f32 %v198_v44, %v67_v39  ;;  %v275_v32 = vpop.permute.xlu1 %274 }
  0xe4   :  { %v222_v46 = vmul.f32 0.5, %v204_v43 }
  0xe5   :  { %v221_v48 = vmul.f32 0.5, %v199_v45  ;;  %v555_v49 = vpop.f32.mrb[6].mxu0 }
  0xe6   :  { %630 = vtanh.f32 %v222_v46  ;;  %v214_v51 = vadd.f32 %v555_v49, %v82_v47  ;;  %v208_v52 = vpop.f32.mrb[7].mxu0 }
  0xe7   :  { %632 = vtanh.f32 %v221_v48  ;;  %v209_v53 = vadd.f32 %v208_v52, %v77_v50 }
  0xe8   :  { %v623_v54 = vpop.eup %622  ;;  %v224_v55 = vmul.f32 0.5, %v214_v51 }
  0xe9   :  { %v625_v56 = vpop.eup %624  ;;  %v223_v57 = vmul.f32 0.5, %v209_v53  ;;  %v234_v58 = vadd.f32 1.0, %v623_v54 }
  0xea   :  { %634 = vtanh.f32 %v224_v55  ;;  %v233_v59 = vadd.f32 1.0, %v625_v56  ;;  %v395_v55 = vld [vmem:[%s832_s5] sm:$0xf]  ;;  %v400_v56 = vpop.permute.xlu0 %399 }
  0xeb   :  { %636 = vtanh.f32 %v223_v57  ;;  %v242_v60 = vmul.f32 0.5, %v234_v58 }
  0xec   :  { %v627_v61 = vpop.eup %626  ;;  %v241_v62 = vmul.f32 0.5, %v233_v59 }
  0xed   :  { %v629_v63 = vpop.eup %628  ;;  %v236_v0 = vadd.f32 1.0, %v627_v61 }
  0xee   :  { %v235_v1 = vadd.f32 1.0, %v629_v63  ;;  %v589_v2 = vpack.c.bf16 %v242_v60, %v241_v62 }
  0xef   :  { %v244_v3 = vmul.f32 0.5, %v236_v0 }
  0xf0   :  { %v631_v4 = vpop.eup %630  ;;  %v243_v5 = vmul.f32 0.5, %v235_v1  ;;  %590 = vmatprep.subr.bf16.mxu1 %v589_v2 }
  0xf1   :  { %v633_v6 = vpop.eup %632  ;;  %v238_v7 = vadd.f32 1.0, %v631_v4  ;;  %592 = vmatpush3.bf16.msra.mxu1 %v589_v2 }
  0xf2   :  { %v237_v8 = vadd.f32 1.0, %v633_v6  ;;  %v593_v9 = vpack.c.bf16 %v244_v3, %v243_v5 }
  0xf3   :  { %v246_v10 = vmul.f32 0.5, %v238_v7 }
  0xf4   :  { %v635_v11 = vpop.eup %634  ;;  %v245_v12 = vmul.f32 0.5, %v237_v8  ;;  %594 = vmatprep.subr.bf16.mxu1 %v593_v9 }
  0xf5   :  { %v637_v13 = vpop.eup %636  ;;  %v240_v14 = vadd.f32 1.0, %v635_v11  ;;  %596 = vmatpush3.bf16.msra.mxu1 %v593_v9 }
  0xf6   :  { %v239_v15 = vadd.f32 1.0, %v637_v13  ;;  %v597_v16 = vpack.c.bf16 %v246_v10, %v245_v12 }
  0xf7   :  { %v248_v17 = vmul.f32 0.5, %v240_v14 }
  0xf8   :  { %v247_v18 = vmul.f32 0.5, %v239_v15  ;;  %598 = vmatprep.subr.bf16.mxu1 %v597_v16 }
  0xf9   :  { %600 = vmatpush3.bf16.msra.mxu1 %v597_v16 }
  0xfa   :  { %v601_v19 = vpack.c.bf16 %v248_v17, %v247_v18 }
  0xfc   :  { %603 = vmatprep.subr.msk.bf16.mxu1 %vm602_vm4, %v601_v19 }
  0xfd   :  { %606 = vmatpush3.bf16.msk.msra.mxu1 %vm602_vm4, %v601_v19 }
 0x100   :  { %573 = vmatmul.mubr.msk.f32.vlgmr.msra.gmra.mrb[0].mxu1 %vm277_vm1, %v250_v20 }
 0x101   :  { %575 = vmatprep.mubr.msk.f32.mxu1 %vm277_vm1, %v251_v21 }
 0x104   :  { %576 = vmatmul.mubr.msk.f32.gmra.mrb[2].mxu1 %vm277_vm1, %v252_v22 }
 0x1d3   :  { %v574_v27 = vpop.f32.mrb[0].mxu1 }
 0x1d4   :  { %v366_v28 = vadd.f32 %v574_v27, %v265_v25  ;;  %v360_v29 = vpop.f32.mrb[1].mxu1 }
 0x1d5   :  { %v361_v30 = vadd.f32 %v360_v29, %v260_v26 }
 0x1d6   :  { %v380_v31 = vmul.f32 0.5, %v366_v28 }
 0x1d7   :  { %v379_v33 = vmul.f32 0.5, %v361_v30  ;;  %v577_v34 = vpop.f32.mrb[2].mxu1 }
 0x1d8   :  { %638 = vtanh.f32 %v380_v31  ;;  %v376_v36 = vadd.f32 %v577_v34, %v275_v32  ;;  %v370_v37 = vpop.f32.mrb[3].mxu1 }
 0x1d9   :  { %640 = vtanh.f32 %v379_v33  ;;  %v371_v38 = vadd.f32 %v370_v37, %v270_v35 }
 0x1da   :  { %v382_v39 = vmul.f32 0.5, %v376_v36 }
 0x1db   :  { %v381_v40 = vmul.f32 0.5, %v371_v38 }
 0x1dc   :  { %642 = vtanh.f32 %v382_v39 }
 0x1dd   :  { %644 = vtanh.f32 %v381_v40 }
 0x1e2   :  { %v639_v41 = vpop.eup %638 }
 0x1e3   :  { %v641_v42 = vpop.eup %640  ;;  %v388_v43 = vadd.f32 1.0, %v639_v41 }
 0x1e4   :  { %v387_v44 = vadd.f32 1.0, %v641_v42 }
 0x1e5   :  { %v392_v45 = vmul.f32 0.5, %v388_v43 }
 0x1e6   :  { %v643_v46 = vpop.eup %642  ;;  %v391_v47 = vmul.f32 0.5, %v387_v44 }
 0x1e7   :  { %v645_v48 = vpop.eup %644  ;;  %v390_v49 = vadd.f32 1.0, %v643_v46 }
 0x1e8   :  { %v608_v50 = vpack.c.bf16 %v392_v45, %v391_v47  ;;  %v389_v51 = vadd.f32 1.0, %v645_v48 }
 0x1e9   :  { %v394_v52 = vmul.f32 0.5, %v390_v49 }
 0x1ea   :  { %v393_v53 = vmul.f32 0.5, %v389_v51  ;;  %609 = vmatpush3.bf16.msra.mxu0 %v608_v50 }
 0x1eb   :  { %610 = vmatprep.subr.bf16.mxu0 %v674_v23 }
 0x1ec   :  { %v611_v54 = vpack.c.bf16 %v394_v52, %v393_v53 }
 0x1ee   :  { %613 = vmatpush3.bf16.msk.msra.mxu0 %vm612_vm7, %v611_v54 }
 0x1f1   :  { %587 = vmatmul.mubr.msk.f32.vlgmr.msra.gmra.mrb[8].mxu0 %vm402_vm8, %v395_v55 }
 0x2c4   :  { %v476_v57 = vpop.f32.mrb[8].mxu0 }
 0x2c5   :  { %v477_v58 = vadd.f32 %v476_v57, %v400_v56  ;;  %v588_v59 = vpop.f32.mrb[9].mxu0 }
 0x2c7   :  { %v480_v60 = vmul.f32 0.5, %v477_v58 }
 0x2c9   :  { %646 = vtanh.f32 %v480_v60 }
 0x2d3   :  { %v647_v61 = vpop.eup %646 }
 0x2d4   :  { %v482_v62 = vadd.f32 1.0, %v647_v61 }
 0x2d6   :  { %v483_v63 = vmul.f32 0.5, %v482_v62 }
 0x2d8   :  { %485 = vst.msk [vmem:[#allocation2] sm:$0xf] %vm484_vm9, %v483_v63 }
 0x2d9   :  { %659 = shalt.err (!%p656_p4)
}
 0x2da   :  { %s660_s29 = scalar_lea.hbm %s834_s7, 64 }
 0x2db   :  { %p661_p5 = scmp.ne.s32.totalorder %s834_s7, %s660_s29  ;;  %p664_p6 = scmp.lt.u32.totalorder %s660_s29, %s834_s7 }
 0x2dd   :  { %p666_p7 = pnand %p664_p6, %p661_p5 }
 0x2df   :  { %669 = shalt.err (!%p666_p7)
}
 0x2e0   :  { %495 = dma.vmem_to_hbm [thread:$0]  %s493_s26, 64, %s834_s7, [#allocation3]  }
 0x2e1   :  { %670 = dma.done.wait [#allocation3], 64  }
 0x2e2   :  { %671 = vsyncadd [#allocation3], 4294967232 }
 0x2e3   :  { %499 = vsyncpa [#allocation3], 1 }

</bundles_post_ra>
